<compile_context>
chip_gen: v7x
topology: tpu7x:2x2x1
jax: 0.10.0
libtpu: 0.0.40
codegen_flags: <defaults>
</compile_context>

<pallas_src>
import functools

import jax
import jax.numpy as jnp
from jax.experimental import pallas as pl
from jax.experimental.pallas import tpu as pltpu


def hier_bilstm_kernel(
    x_ref,            # [S, 2E]  bf16  lane-concat of prev/fut input halves
    wih_ref,          # [2E, 8H] bf16  block-diagonal, gate-permuted input weights
    whh_ref,          # [2H, 8H] bf16  block-diagonal, gate-permuted recurrent weights
    b_ref,            # [1, 8H]  f32   combined, gate-permuted biases
    h0_ref, c0_ref,   # [1, 2H]  f32   [prev | fut] initial states
    wq_p_ref, wk_p_ref, battn_p_ref, walpha_p_ref, balpha_p_ref,
    wq_f_ref, wk_f_ref, battn_f_ref, walpha_f_ref, balpha_f_ref,
    w1_ref, b1_ref, w2_ref, b2_ref, w3_ref, b3_ref,
    wtag_ref, btag_ref,
    out_ref,          # [1, T]  f32
    hseq_ref,         # VMEM scratch [S, 2H] f32
    *, seq_len, hidden):
  S, H = seq_len, hidden
  H2, H4, H6 = 2 * H, 4 * H, 6 * H
  f32, bf16 = jnp.float32, jnp.bfloat16

  # ---------------- both LSTM chains, fused into one recurrence ------------
  # Hoisted input projection for all timesteps and both chains at once
  # (single MXU matmul, off the recurrence critical path).
  xw = jnp.dot(x_ref[...], wih_ref[...], preferred_element_type=f32) + b_ref[...]

  whh = whh_ref[...]           # bf16 [2H, 8H]
  h = h0_ref[...]              # [1, 2H] f32, layout [h_prev | h_fut]
  c = c0_ref[...]              # [1, 2H] f32

  # S is small and static -> full unroll keeps one basic block for the LLO
  # scheduler.  (Switch to lax.fori_loop writing into hseq_ref if S >= 64.)
  for t in range(S):
    gates = xw[t:t + 1, :] + jnp.dot(h.astype(bf16), whh,
                                     preferred_element_type=f32)   # [1, 8H]
    # combined gate layout: [i_p,i_f, f_p,f_f, o_p,o_f, g_p,g_f]
    ifo = jax.nn.sigmoid(gates[:, :H6])   # one sigmoid for i/f/o of both chains
    g = jnp.tanh(gates[:, H6:])           # [1, 2H]
    c = ifo[:, H2:H4] * c + ifo[:, :H2] * g
    h = ifo[:, H4:H6] * jnp.tanh(c)
    hseq_ref[pl.ds(t, 1), :] = h

  hseq = hseq_ref[...]          # [S, 2H]
  prev_out = hseq[:, :H]        # [S, H]
  fut_out = hseq[:, H:]         # [S, H]
  prev_last = h[:, :H]          # [1, H]  (last step, no reload)
  fut_last = h[:, H:]           # [1, H]

  # -------------------------------- attention ------------------------------
  def attention(q_last, keys, values, wq_ref, wk_ref, battn_ref,
                walpha_ref, balpha_ref):
    # tanh([q, keys] @ W_attn + b) with W_attn split into Wq / Wk so the
    # reference's broadcast + lane-concatenate is never materialized.
    qw = jnp.dot(q_last.astype(bf16), wq_ref[...], preferred_element_type=f32)
    kw = jnp.dot(keys.astype(bf16), wk_ref[...], preferred_element_type=f32)
    simi = jnp.tanh(kw + qw + battn_ref[...])                        # [S, HLS]
    logits = jnp.dot(simi.astype(bf16), walpha_ref[...],
                     preferred_element_type=f32) + balpha_ref[...]   # [S, 1]
    logits = logits - jnp.max(logits, axis=0, keepdims=True)
    e = jnp.exp(logits)
    w = e / jnp.sum(e, axis=0, keepdims=True)                        # softmax over S
    return jnp.sum(w * values, axis=0, keepdims=True)                # [1, H]

  # m_p: query = last previous state, keys = values = future outputs.
  m_p = attention(prev_last, fut_out, fut_out,
                  wq_p_ref, wk_p_ref, battn_p_ref, walpha_p_ref, balpha_p_ref)
  # m_f: query = last future state, keys = previous outputs, values = FUTURE
  # outputs — this mirrors the reference attention_vector(..., previous=False)
  # exactly (it multiplies by seq_tensor_output_p = the future sequence).
  m_f = attention(fut_last, prev_out, fut_out,
                  wq_f_ref, wk_f_ref, battn_f_ref, walpha_f_ref, balpha_f_ref)

  # -------------------------------- MLP head -------------------------------
  feat = jnp.concatenate([h, m_p, m_f], axis=1)      # [1, 4H]; h = [prev|fut]
  h1 = jnp.tanh(jnp.dot(feat.astype(bf16), w1_ref[...],
                        preferred_element_type=f32) + b1_ref[...])
  h2 = jnp.tanh(jnp.dot(h1.astype(bf16), w2_ref[...],
                        preferred_element_type=f32) + b2_ref[...])
  h3 = jnp.tanh(jnp.dot(h2.astype(bf16), w3_ref[...],
                        preferred_element_type=f32) + b3_ref[...])
  tag = jnp.dot(h3.astype(bf16), wtag_ref[...],
                preferred_element_type=f32) + btag_ref[...]          # [1, T]
  out_ref[...] = jax.nn.sigmoid(tag)


# ------------------------- parameter construction ---------------------------

def _init_linear(key, in_dim, out_dim):
  k1, k2 = jax.random.split(key)
  bound = 1.0 / (in_dim ** 0.5)
  w = jax.random.uniform(k1, (out_dim, in_dim), jnp.float32, -bound, bound)
  b = jax.random.uniform(k2, (out_dim,), jnp.float32, -bound, bound)
  return w, b


def _init_lstm(key, in_dim, hidden):
  k1, k2, k3, k4 = jax.random.split(key, 4)
  bound = 1.0 / (hidden ** 0.5)
  w_ih = jax.random.uniform(k1, (4 * hidden, in_dim), jnp.float32, -bound, bound)
  w_hh = jax.random.uniform(k2, (4 * hidden, hidden), jnp.float32, -bound, bound)
  b_ih = jax.random.uniform(k3, (4 * hidden,), jnp.float32, -bound, bound)
  b_hh = jax.random.uniform(k4, (4 * hidden,), jnp.float32, -bound, bound)
  return w_ih, w_hh, b_ih, b_hh


def make_params(key, embedding_dim, hidden_dim, hidden_linear_size, target_size):
  ks = jax.random.split(key, 12)
  p = {}
  p['lstm_prev'] = _init_lstm(ks[0], embedding_dim, hidden_dim)
  p['lstm_fut'] = _init_lstm(ks[1], embedding_dim, hidden_dim)
  # self.hidden = init_hidden(batch_size=1) in __init__ -> fixed (h0, c0)
  # shared by both LSTMs across forward calls (matches the PyTorch module).
  p['h0'] = jax.random.normal(ks[2], (1, hidden_dim), jnp.float32)
  p['c0'] = jax.random.normal(ks[3], (1, hidden_dim), jnp.float32)
  p['attn_prev'] = _init_linear(ks[4], 2 * hidden_dim, hidden_linear_size)
  p['alpha_prev'] = _init_linear(ks[5], hidden_linear_size, 1)
  p['attn_fut'] = _init_linear(ks[6], 2 * hidden_dim, hidden_linear_size)
  p['alpha_fut'] = _init_linear(ks[7], hidden_linear_size, 1)
  p['lin1'] = _init_linear(ks[8], 4 * hidden_dim, 2 * hidden_dim)
  p['lin2'] = _init_linear(ks[9], 2 * hidden_dim, hidden_dim)
  p['lin3'] = _init_linear(ks[10], hidden_dim, hidden_dim)
  p['hidden2tag'] = _init_linear(ks[11], hidden_dim, target_size)
  return p


def _combine_lstm_weights(lstm_p, lstm_f, E, H):
  """Block-diagonal, gate-permuted weights so ONE matmul drives both chains.

  PyTorch gate order is (i, f, g, o); combined column layout is
  [i_p,i_f, f_p,f_f, o_p,o_f, g_p,g_f] so sigmoid covers the first 6H columns
  and tanh the last 2H.
  """
  wih_p, whh_p, bih_p, bhh_p = lstm_p
  wih_f, whh_f, bih_f, bhh_f = lstm_f

  def gate_cols(w_t):   # w_t: [in, 4H] in torch order (i, f, g, o)
    return (w_t[:, 0:H], w_t[:, H:2 * H], w_t[:, 2 * H:3 * H], w_t[:, 3 * H:4 * H])

  def blockdiag(wp_t, wf_t, in_dim):
    ip, fp, gp, op = gate_cols(wp_t)
    iF, fF, gF, oF = gate_cols(wf_t)
    z = jnp.zeros((in_dim, H), jnp.float32)
    top = jnp.concatenate([ip, z, fp, z, op, z, gp, z], axis=1)
    bot = jnp.concatenate([z, iF, z, fF, z, oF, z, gF], axis=1)
    return jnp.concatenate([top, bot], axis=0)          # [2*in_dim, 8H]

  wih_blk = blockdiag(wih_p.T, wih_f.T, E)
  whh_blk = blockdiag(whh_p.T, whh_f.T, H)

  bp = bih_p + bhh_p
  bq = bih_f + bhh_f
  blk = lambda b, k: b[k * H:(k + 1) * H]
  b_comb = jnp.concatenate([blk(bp, 0), blk(bq, 0),     # i
                            blk(bp, 1), blk(bq, 1),     # f
                            blk(bp, 3), blk(bq, 3),     # o
                            blk(bp, 2), blk(bq, 2)])    # g
  return wih_blk, whh_blk, b_comb.reshape(1, -1)


# ---------------------------------- wrapper ----------------------------------

def hierarchical_bilstm_forward(sentences_emb, params, *, hidden_dim, target_size):
  L, B, E = sentences_emb.shape
  assert B == 1, "reference module's init_hidden() implies batch_size == 1"
  S = L // 2
  H = hidden_dim
  bf16 = jnp.bfloat16

  xp = sentences_emb[:S, 0, :]                       # previous half [S, E]
  xf = sentences_emb[S:, 0, :]                       # future half   [S, E]
  x_comb = jnp.concatenate([xp, xf], axis=1).astype(bf16)   # [S, 2E]

  wih_blk, whh_blk, b_comb = _combine_lstm_weights(
      params['lstm_prev'], params['lstm_fut'], E, H)

  h0c = jnp.concatenate([params['h0'], params['h0']], axis=1)   # [1, 2H]
  c0c = jnp.concatenate([params['c0'], params['c0']], axis=1)   # [1, 2H]

  def attn(attn_name, alpha_name):
    w_attn, b_attn = params[attn_name]       # [HLS, 2H]
    w_alpha, b_alpha = params[alpha_name]    # [1, HLS]
    wt = w_attn.T                            # [2H, HLS]
    return (wt[:H, :].astype(bf16),          # Wq  (query columns of the concat)
            wt[H:, :].astype(bf16),          # Wk  (key columns)
            b_attn.reshape(1, -1),
            w_alpha.T.astype(bf16),          # [HLS, 1]
            b_alpha.reshape(1, -1))

  def lin(name):
    w, b = params[name]
    return w.T.astype(bf16), b.reshape(1, -1)

  args = (
      x_comb,
      wih_blk.astype(bf16), whh_blk.astype(bf16), b_comb,
      h0c, c0c,
      *attn('attn_prev', 'alpha_prev'),
      *attn('attn_fut', 'alpha_fut'),
      *lin('lin1'), *lin('lin2'), *lin('lin3'),
      *lin('hidden2tag'),
  )

  kernel = functools.partial(hier_bilstm_kernel, seq_len=S, hidden=H)
  # Everything (weights + both halves) is well under 1 MiB, so whole-array
  # VMEM residency is fine on v5e/v6e (128 MiB) and v7x (64 MiB) alike.
  return pl.pallas_call(
      kernel,
      out_shape=jax.ShapeDtypeStruct((1, target_size), jnp.float32),
      in_specs=[pl.BlockSpec(memory_space=pltpu.MemorySpace.VMEM)] * len(args),
      out_specs=pl.BlockSpec(memory_space=pltpu.MemorySpace.VMEM),
      scratch_shapes=[pltpu.VMEM((S, 2 * H), jnp.float32)],
  )(*args)


if __name__ == "__main__":
  # small config: bidirectional=False (required by attn_previous in_features),
  # num_layers=1 (so LSTM dropout is inert), type_sentence_embedding != 'lstm'
  L, B = 8, 1
  EMB, HID, HLS, TGT = 16, 32, 16, 4

  key = jax.random.PRNGKey(0)
  k_params, k_x = jax.random.split(key)
  params = make_params(k_params, EMB, HID, HLS, TGT)
  sentences_emb = jax.random.normal(k_x, (L, B, EMB), jnp.float32)

  pred = hierarchical_bilstm_forward(sentences_emb, params,
                                     hidden_dim=HID, target_size=TGT)
  pred = jax.block_until_ready(pred)
  assert pred.shape == (B, TGT)
  # TODO(synk): forward_sentence() (pack_padded_sequence path) is not part of
  # forward() and is not implemented here.
  print("KERNEL_OK")
</pallas_src>

<mosaic_0001>
module attributes {stable_mosaic.version = 11 : i64} {
  func.func @hier_bilstm_kernel(%arg0: memref<4x32xbf16, #tpu.memory_space<vmem>>, %arg1: memref<32x256xbf16, #tpu.memory_space<vmem>>, %arg2: memref<64x256xbf16, #tpu.memory_space<vmem>>, %arg3: memref<1x256xf32, #tpu.memory_space<vmem>>, %arg4: memref<1x64xf32, #tpu.memory_space<vmem>>, %arg5: memref<1x64xf32, #tpu.memory_space<vmem>>, %arg6: memref<32x16xbf16, #tpu.memory_space<vmem>>, %arg7: memref<32x16xbf16, #tpu.memory_space<vmem>>, %arg8: memref<1x16xf32, #tpu.memory_space<vmem>>, %arg9: memref<16x1xbf16, #tpu.memory_space<vmem>>, %arg10: memref<1x1xf32, #tpu.memory_space<vmem>>, %arg11: memref<32x16xbf16, #tpu.memory_space<vmem>>, %arg12: memref<32x16xbf16, #tpu.memory_space<vmem>>, %arg13: memref<1x16xf32, #tpu.memory_space<vmem>>, %arg14: memref<16x1xbf16, #tpu.memory_space<vmem>>, %arg15: memref<1x1xf32, #tpu.memory_space<vmem>>, %arg16: memref<128x64xbf16, #tpu.memory_space<vmem>>, %arg17: memref<1x64xf32, #tpu.memory_space<vmem>>, %arg18: memref<64x32xbf16, #tpu.memory_space<vmem>>, %arg19: memref<1x32xf32, #tpu.memory_space<vmem>>, %arg20: memref<32x32xbf16, #tpu.memory_space<vmem>>, %arg21: memref<1x32xf32, #tpu.memory_space<vmem>>, %arg22: memref<32x4xbf16, #tpu.memory_space<vmem>>, %arg23: memref<1x4xf32, #tpu.memory_space<vmem>>, %arg24: memref<1x4xf32, #tpu.memory_space<vmem>>, %arg25: memref<4x64xf32, #tpu.memory_space<vmem>>) attributes {dimension_semantics = [], scalar_prefetch = 0 : i64, scratch_operands = 1 : i64, tpu.core_type = #tpu.core_type<tc>} {
    %c0 = arith.constant 0 : index
    %c0_0 = arith.constant 0 : index
    %0 = vector.load %arg0[%c0, %c0_0] : memref<4x32xbf16, #tpu.memory_space<vmem>>, vector<4x32xbf16>
    %c0_1 = arith.constant 0 : index
    %c0_2 = arith.constant 0 : index
    %1 = vector.load %arg1[%c0_1, %c0_2] : memref<32x256xbf16, #tpu.memory_space<vmem>>, vector<32x256xbf16>
    %cst = arith.constant dense<0.000000e+00> : vector<4x256xf32>
    %2 = tpu.matmul %0, %1, %cst {dimension_numbers = #tpu.dot_dimension_numbers<[1], [0], [0], [1], [0, 0, 1, 1], [], []>} : vector<4x32xbf16>, vector<32x256xbf16>, vector<4x256xf32> -> vector<4x256xf32>
    %c0_3 = arith.constant 0 : index
    %c0_4 = arith.constant 0 : index
    %3 = vector.load %arg3[%c0_3, %c0_4] : memref<1x256xf32, #tpu.memory_space<vmem>>, vector<1x256xf32>
    %4 = vector.broadcast %3 : vector<1x256xf32> to vector<4x256xf32>
    %5 = arith.addf %2, %4 : vector<4x256xf32>
    %c0_5 = arith.constant 0 : index
    %c0_6 = arith.constant 0 : index
    %6 = vector.load %arg2[%c0_5, %c0_6] : memref<64x256xbf16, #tpu.memory_space<vmem>>, vector<64x256xbf16>
    %c0_7 = arith.constant 0 : index
    %c0_8 = arith.constant 0 : index
    %7 = vector.load %arg4[%c0_7, %c0_8] : memref<1x64xf32, #tpu.memory_space<vmem>>, vector<1x64xf32>
    %c0_9 = arith.constant 0 : index
    %c0_10 = arith.constant 0 : index
    %8 = vector.load %arg5[%c0_9, %c0_10] : memref<1x64xf32, #tpu.memory_space<vmem>>, vector<1x64xf32>
    %9 = vector.extract_strided_slice %5 {offsets = [0, 0], sizes = [1, 256], strides = [1, 1]} : vector<4x256xf32> to vector<1x256xf32>
    %10 = arith.truncf %7 : vector<1x64xf32> to vector<1x64xbf16>
    %cst_11 = arith.constant dense<0.000000e+00> : vector<1x256xf32>
    %11 = tpu.matmul %10, %6, %cst_11 {dimension_numbers = #tpu.dot_dimension_numbers<[1], [0], [0], [1], [0, 0, 1, 1], [], []>} : vector<1x64xbf16>, vector<64x256xbf16>, vector<1x256xf32> -> vector<1x256xf32>
    %12 = arith.addf %9, %11 : vector<1x256xf32>
    %13 = vector.extract_strided_slice %12 {offsets = [0, 0], sizes = [1, 192], strides = [1, 1]} : vector<1x256xf32> to vector<1x192xf32>
    %14 = arith.negf %13 : vector<1x192xf32>
    %15 = math.exp %14 : vector<1x192xf32>
    %cst_12 = arith.constant 1.000000e+00 : f32
    %16 = vector.broadcast %cst_12 : f32 to vector<1x192xf32>
    %17 = arith.addf %16, %15 : vector<1x192xf32>
    %18 = arith.divf %16, %17 : vector<1x192xf32>
    %19 = vector.extract_strided_slice %12 {offsets = [0, 192], sizes = [1, 64], strides = [1, 1]} : vector<1x256xf32> to vector<1x64xf32>
    %20 = math.tanh %19 : vector<1x64xf32>
    %21 = vector.extract_strided_slice %18 {offsets = [0, 64], sizes = [1, 64], strides = [1, 1]} : vector<1x192xf32> to vector<1x64xf32>
    %22 = arith.mulf %21, %8 : vector<1x64xf32>
    %23 = vector.extract_strided_slice %18 {offsets = [0, 0], sizes = [1, 64], strides = [1, 1]} : vector<1x192xf32> to vector<1x64xf32>
    %24 = arith.mulf %23, %20 : vector<1x64xf32>
    %25 = arith.addf %22, %24 : vector<1x64xf32>
    %26 = vector.extract_strided_slice %18 {offsets = [0, 128], sizes = [1, 64], strides = [1, 1]} : vector<1x192xf32> to vector<1x64xf32>
    %27 = math.tanh %25 : vector<1x64xf32>
    %28 = arith.mulf %26, %27 : vector<1x64xf32>
    %c0_13 = arith.constant 0 : index
    %c0_14 = arith.constant 0 : index
    %29 = vector.load %arg25[%c0_13, %c0_14] : memref<4x64xf32, #tpu.memory_space<vmem>>, vector<1x64xf32>
    tpu.vector_store %arg25[%c0_13, %c0_14], %28 {strides = array<i32>} : memref<4x64xf32, #tpu.memory_space<vmem>>, vector<1x64xf32>,
    %30 = vector.extract_strided_slice %5 {offsets = [1, 0], sizes = [1, 256], strides = [1, 1]} : vector<4x256xf32> to vector<1x256xf32>
    %31 = arith.truncf %28 : vector<1x64xf32> to vector<1x64xbf16>
    %cst_15 = arith.constant dense<0.000000e+00> : vector<1x256xf32>
    %32 = tpu.matmul %31, %6, %cst_15 {dimension_numbers = #tpu.dot_dimension_numbers<[1], [0], [0], [1], [0, 0, 1, 1], [], []>} : vector<1x64xbf16>, vector<64x256xbf16>, vector<1x256xf32> -> vector<1x256xf32>
    %33 = arith.addf %30, %32 : vector<1x256xf32>
    %34 = vector.extract_strided_slice %33 {offsets = [0, 0], sizes = [1, 192], strides = [1, 1]} : vector<1x256xf32> to vector<1x192xf32>
    %35 = arith.negf %34 : vector<1x192xf32>
    %36 = math.exp %35 : vector<1x192xf32>
    %cst_16 = arith.constant 1.000000e+00 : f32
    %37 = vector.broadcast %cst_16 : f32 to vector<1x192xf32>
    %38 = arith.addf %37, %36 : vector<1x192xf32>
    %39 = arith.divf %37, %38 : vector<1x192xf32>
    %40 = vector.extract_strided_slice %33 {offsets = [0, 192], sizes = [1, 64], strides = [1, 1]} : vector<1x256xf32> to vector<1x64xf32>
    %41 = math.tanh %40 : vector<1x64xf32>
    %42 = vector.extract_strided_slice %39 {offsets = [0, 64], sizes = [1, 64], strides = [1, 1]} : vector<1x192xf32> to vector<1x64xf32>
    %43 = arith.mulf %42, %25 : vector<1x64xf32>
    %44 = vector.extract_strided_slice %39 {offsets = [0, 0], sizes = [1, 64], strides = [1, 1]} : vector<1x192xf32> to vector<1x64xf32>
    %45 = arith.mulf %44, %41 : vector<1x64xf32>
    %46 = arith.addf %43, %45 : vector<1x64xf32>
    %47 = vector.extract_strided_slice %39 {offsets = [0, 128], sizes = [1, 64], strides = [1, 1]} : vector<1x192xf32> to vector<1x64xf32>
    %48 = math.tanh %46 : vector<1x64xf32>
    %49 = arith.mulf %47, %48 : vector<1x64xf32>
    %c1 = arith.constant 1 : index
    %c0_17 = arith.constant 0 : index
    %50 = vector.load %arg25[%c1, %c0_17] : memref<4x64xf32, #tpu.memory_space<vmem>>, vector<1x64xf32>
    tpu.vector_store %arg25[%c1, %c0_17], %49 {strides = array<i32>} : memref<4x64xf32, #tpu.memory_space<vmem>>, vector<1x64xf32>,
    %51 = vector.extract_strided_slice %5 {offsets = [2, 0], sizes = [1, 256], strides = [1, 1]} : vector<4x256xf32> to vector<1x256xf32>
    %52 = arith.truncf %49 : vector<1x64xf32> to vector<1x64xbf16>
    %cst_18 = arith.constant dense<0.000000e+00> : vector<1x256xf32>
    %53 = tpu.matmul %52, %6, %cst_18 {dimension_numbers = #tpu.dot_dimension_numbers<[1], [0], [0], [1], [0, 0, 1, 1], [], []>} : vector<1x64xbf16>, vector<64x256xbf16>, vector<1x256xf32> -> vector<1x256xf32>
    %54 = arith.addf %51, %53 : vector<1x256xf32>
    %55 = vector.extract_strided_slice %54 {offsets = [0, 0], sizes = [1, 192], strides = [1, 1]} : vector<1x256xf32> to vector<1x192xf32>
    %56 = arith.negf %55 : vector<1x192xf32>
    %57 = math.exp %56 : vector<1x192xf32>
    %cst_19 = arith.constant 1.000000e+00 : f32
    %58 = vector.broadcast %cst_19 : f32 to vector<1x192xf32>
    %59 = arith.addf %58, %57 : vector<1x192xf32>
    %60 = arith.divf %58, %59 : vector<1x192xf32>
    %61 = vector.extract_strided_slice %54 {offsets = [0, 192], sizes = [1, 64], strides = [1, 1]} : vector<1x256xf32> to vector<1x64xf32>
    %62 = math.tanh %61 : vector<1x64xf32>
    %63 = vector.extract_strided_slice %60 {offsets = [0, 64], sizes = [1, 64], strides = [1, 1]} : vector<1x192xf32> to vector<1x64xf32>
    %64 = arith.mulf %63, %46 : vector<1x64xf32>
    %65 = vector.extract_strided_slice %60 {offsets = [0, 0], sizes = [1, 64], strides = [1, 1]} : vector<1x192xf32> to vector<1x64xf32>
    %66 = arith.mulf %65, %62 : vector<1x64xf32>
    %67 = arith.addf %64, %66 : vector<1x64xf32>
    %68 = vector.extract_strided_slice %60 {offsets = [0, 128], sizes = [1, 64], strides = [1, 1]} : vector<1x192xf32> to vector<1x64xf32>
    %69 = math.tanh %67 : vector<1x64xf32>
    %70 = arith.mulf %68, %69 : vector<1x64xf32>
    %c2 = arith.constant 2 : index
    %c0_20 = arith.constant 0 : index
    %71 = vector.load %arg25[%c2, %c0_20] : memref<4x64xf32, #tpu.memory_space<vmem>>, vector<1x64xf32>
    tpu.vector_store %arg25[%c2, %c0_20], %70 {strides = array<i32>} : memref<4x64xf32, #tpu.memory_space<vmem>>, vector<1x64xf32>,
    %72 = vector.extract_strided_slice %5 {offsets = [3, 0], sizes = [1, 256], strides = [1, 1]} : vector<4x256xf32> to vector<1x256xf32>
    %73 = arith.truncf %70 : vector<1x64xf32> to vector<1x64xbf16>
    %cst_21 = arith.constant dense<0.000000e+00> : vector<1x256xf32>
    %74 = tpu.matmul %73, %6, %cst_21 {dimension_numbers = #tpu.dot_dimension_numbers<[1], [0], [0], [1], [0, 0, 1, 1], [], []>} : vector<1x64xbf16>, vector<64x256xbf16>, vector<1x256xf32> -> vector<1x256xf32>
    %75 = arith.addf %72, %74 : vector<1x256xf32>
    %76 = vector.extract_strided_slice %75 {offsets = [0, 0], sizes = [1, 192], strides = [1, 1]} : vector<1x256xf32> to vector<1x192xf32>
    %77 = arith.negf %76 : vector<1x192xf32>
    %78 = math.exp %77 : vector<1x192xf32>
    %cst_22 = arith.constant 1.000000e+00 : f32
    %79 = vector.broadcast %cst_22 : f32 to vector<1x192xf32>
    %80 = arith.addf %79, %78 : vector<1x192xf32>
    %81 = arith.divf %79, %80 : vector<1x192xf32>
    %82 = vector.extract_strided_slice %75 {offsets = [0, 192], sizes = [1, 64], strides = [1, 1]} : vector<1x256xf32> to vector<1x64xf32>
    %83 = math.tanh %82 : vector<1x64xf32>
    %84 = vector.extract_strided_slice %81 {offsets = [0, 64], sizes = [1, 64], strides = [1, 1]} : vector<1x192xf32> to vector<1x64xf32>
    %85 = arith.mulf %84, %67 : vector<1x64xf32>
    %86 = vector.extract_strided_slice %81 {offsets = [0, 0], sizes = [1, 64], strides = [1, 1]} : vector<1x192xf32> to vector<1x64xf32>
    %87 = arith.mulf %86, %83 : vector<1x64xf32>
    %88 = arith.addf %85, %87 : vector<1x64xf32>
    %89 = vector.extract_strided_slice %81 {offsets = [0, 128], sizes = [1, 64], strides = [1, 1]} : vector<1x192xf32> to vector<1x64xf32>
    %90 = math.tanh %88 : vector<1x64xf32>
    %91 = arith.mulf %89, %90 : vector<1x64xf32>
    %c3 = arith.constant 3 : index
    %c0_23 = arith.constant 0 : index
    %92 = vector.load %arg25[%c3, %c0_23] : memref<4x64xf32, #tpu.memory_space<vmem>>, vector<1x64xf32>
    tpu.vector_store %arg25[%c3, %c0_23], %91 {strides = array<i32>} : memref<4x64xf32, #tpu.memory_space<vmem>>, vector<1x64xf32>,
    %c0_24 = arith.constant 0 : index
    %c0_25 = arith.constant 0 : index
    %93 = vector.load %arg25[%c0_24, %c0_25] : memref<4x64xf32, #tpu.memory_space<vmem>>, vector<4x64xf32>
    %94 = vector.extract_strided_slice %93 {offsets = [0, 0], sizes = [4, 32], strides = [1, 1]} : vector<4x64xf32> to vector<4x32xf32>
    %95 = vector.extract_strided_slice %93 {offsets = [0, 32], sizes = [4, 32], strides = [1, 1]} : vector<4x64xf32> to vector<4x32xf32>
    %96 = vector.extract_strided_slice %91 {offsets = [0, 0], sizes = [1, 32], strides = [1, 1]} : vector<1x64xf32> to vector<1x32xf32>
    %97 = vector.extract_strided_slice %91 {offsets = [0, 32], sizes = [1, 32], strides = [1, 1]} : vector<1x64xf32> to vector<1x32xf32>
    %98 = arith.truncf %96 : vector<1x32xf32> to vector<1x32xbf16>
    %c0_26 = arith.constant 0 : index
    %c0_27 = arith.constant 0 : index
    %99 = vector.load %arg6[%c0_26, %c0_27] : memref<32x16xbf16, #tpu.memory_space<vmem>>, vector<32x16xbf16>
    %cst_28 = arith.constant dense<0.000000e+00> : vector<1x16xf32>
    %100 = tpu.matmul %98, %99, %cst_28 {dimension_numbers = #tpu.dot_dimension_numbers<[1], [0], [0], [1], [0, 0, 1, 1], [], []>} : vector<1x32xbf16>, vector<32x16xbf16>, vector<1x16xf32> -> vector<1x16xf32>
    %101 = arith.truncf %95 : vector<4x32xf32> to vector<4x32xbf16>
    %c0_29 = arith.constant 0 : index
    %c0_30 = arith.constant 0 : index
    %102 = vector.load %arg7[%c0_29, %c0_30] : memref<32x16xbf16, #tpu.memory_space<vmem>>, vector<32x16xbf16>
    %cst_31 = arith.constant dense<0.000000e+00> : vector<4x16xf32>
    %103 = tpu.matmul %101, %102, %cst_31 {dimension_numbers = #tpu.dot_dimension_numbers<[1], [0], [0], [1], [0, 0, 1, 1], [], []>} : vector<4x32xbf16>, vector<32x16xbf16>, vector<4x16xf32> -> vector<4x16xf32>
    %104 = vector.broadcast %100 : vector<1x16xf32> to vector<4x16xf32>
    %105 = arith.addf %103, %104 : vector<4x16xf32>
    %c0_32 = arith.constant 0 : index
    %c0_33 = arith.constant 0 : index
    %106 = vector.load %arg8[%c0_32, %c0_33] : memref<1x16xf32, #tpu.memory_space<vmem>>, vector<1x16xf32>
    %107 = vector.broadcast %106 : vector<1x16xf32> to vector<4x16xf32>
    %108 = arith.addf %105, %107 : vector<4x16xf32>
    %109 = math.tanh %108 : vector<4x16xf32>
    %110 = arith.truncf %109 : vector<4x16xf32> to vector<4x16xbf16>
    %c0_34 = arith.constant 0 : index
    %c0_35 = arith.constant 0 : index
    %111 = vector.load %arg9[%c0_34, %c0_35] : memref<16x1xbf16, #tpu.memory_space<vmem>>, vector<16x1xbf16>
    %cst_36 = arith.constant dense<0.000000e+00> : vector<4x1xf32>
    %112 = tpu.matmul %110, %111, %cst_36 {dimension_numbers = #tpu.dot_dimension_numbers<[1], [0], [0], [1], [0, 0, 1, 1], [], []>} : vector<4x16xbf16>, vector<16x1xbf16>, vector<4x1xf32> -> vector<4x1xf32>
    %c0_37 = arith.constant 0 : index
    %c0_38 = arith.constant 0 : index
    %113 = vector.load %arg10[%c0_37, %c0_38] : memref<1x1xf32, #tpu.memory_space<vmem>>, vector<1x1xf32>
    %114 = vector.broadcast %113 : vector<1x1xf32> to vector<4x1xf32>
    %115 = arith.addf %112, %114 : vector<4x1xf32>
    %cst_39 = arith.constant dense<0xFF800000> : vector<1xf32>
    %116 = vector.multi_reduction <maximumf>, %115, %cst_39 [0] : vector<4x1xf32> to vector<1xf32>
    %117 = vector.shape_cast %116 : vector<1xf32> to vector<1x1xf32>
    %118 = vector.broadcast %117 : vector<1x1xf32> to vector<4x1xf32>
    %119 = arith.subf %115, %118 : vector<4x1xf32>
    %120 = math.exp %119 : vector<4x1xf32>
    %cst_40 = arith.constant dense<0.000000e+00> : vector<1xf32>
    %121 = vector.multi_reduction <add>, %120, %cst_40 [0] : vector<4x1xf32> to vector<1xf32>
    %122 = vector.shape_cast %121 : vector<1xf32> to vector<1x1xf32>
    %123 = vector.broadcast %122 : vector<1x1xf32> to vector<4x1xf32>
    %124 = arith.divf %120, %123 : vector<4x1xf32>
    %125 = vector.broadcast %124 : vector<4x1xf32> to vector<4x32xf32>
    %126 = arith.mulf %125, %95 : vector<4x32xf32>
    %cst_41 = arith.constant dense<0.000000e+00> : vector<32xf32>
    %127 = vector.multi_reduction <add>, %126, %cst_41 [0] : vector<4x32xf32> to vector<32xf32>
    %128 = vector.shape_cast %127 : vector<32xf32> to vector<1x32xf32>
    %129 = arith.truncf %97 : vector<1x32xf32> to vector<1x32xbf16>
    %c0_42 = arith.constant 0 : index
    %c0_43 = arith.constant 0 : index
    %130 = vector.load %arg11[%c0_42, %c0_43] : memref<32x16xbf16, #tpu.memory_space<vmem>>, vector<32x16xbf16>
    %cst_44 = arith.constant dense<0.000000e+00> : vector<1x16xf32>
    %131 = tpu.matmul %129, %130, %cst_44 {dimension_numbers = #tpu.dot_dimension_numbers<[1], [0], [0], [1], [0, 0, 1, 1], [], []>} : vector<1x32xbf16>, vector<32x16xbf16>, vector<1x16xf32> -> vector<1x16xf32>
    %132 = arith.truncf %94 : vector<4x32xf32> to vector<4x32xbf16>
    %c0_45 = arith.constant 0 : index
    %c0_46 = arith.constant 0 : index
    %133 = vector.load %arg12[%c0_45, %c0_46] : memref<32x16xbf16, #tpu.memory_space<vmem>>, vector<32x16xbf16>
    %cst_47 = arith.constant dense<0.000000e+00> : vector<4x16xf32>
    %134 = tpu.matmul %132, %133, %cst_47 {dimension_numbers = #tpu.dot_dimension_numbers<[1], [0], [0], [1], [0, 0, 1, 1], [], []>} : vector<4x32xbf16>, vector<32x16xbf16>, vector<4x16xf32> -> vector<4x16xf32>
    %135 = vector.broadcast %131 : vector<1x16xf32> to vector<4x16xf32>
    %136 = arith.addf %134, %135 : vector<4x16xf32>
    %c0_48 = arith.constant 0 : index
    %c0_49 = arith.constant 0 : index
    %137 = vector.load %arg13[%c0_48, %c0_49] : memref<1x16xf32, #tpu.memory_space<vmem>>, vector<1x16xf32>
    %138 = vector.broadcast %137 : vector<1x16xf32> to vector<4x16xf32>
    %139 = arith.addf %136, %138 : vector<4x16xf32>
    %140 = math.tanh %139 : vector<4x16xf32>
    %141 = arith.truncf %140 : vector<4x16xf32> to vector<4x16xbf16>
    %c0_50 = arith.constant 0 : index
    %c0_51 = arith.constant 0 : index
    %142 = vector.load %arg14[%c0_50, %c0_51] : memref<16x1xbf16, #tpu.memory_space<vmem>>, vector<16x1xbf16>
    %cst_52 = arith.constant dense<0.000000e+00> : vector<4x1xf32>
    %143 = tpu.matmul %141, %142, %cst_52 {dimension_numbers = #tpu.dot_dimension_numbers<[1], [0], [0], [1], [0, 0, 1, 1], [], []>} : vector<4x16xbf16>, vector<16x1xbf16>, vector<4x1xf32> -> vector<4x1xf32>
    %c0_53 = arith.constant 0 : index
    %c0_54 = arith.constant 0 : index
    %144 = vector.load %arg15[%c0_53, %c0_54] : memref<1x1xf32, #tpu.memory_space<vmem>>, vector<1x1xf32>
    %145 = vector.broadcast %144 : vector<1x1xf32> to vector<4x1xf32>
    %146 = arith.addf %143, %145 : vector<4x1xf32>
    %cst_55 = arith.constant dense<0xFF800000> : vector<1xf32>
    %147 = vector.multi_reduction <maximumf>, %146, %cst_55 [0] : vector<4x1xf32> to vector<1xf32>
    %148 = vector.shape_cast %147 : vector<1xf32> to vector<1x1xf32>
    %149 = vector.broadcast %148 : vector<1x1xf32> to vector<4x1xf32>
    %150 = arith.subf %146, %149 : vector<4x1xf32>
    %151 = math.exp %150 : vector<4x1xf32>
    %cst_56 = arith.constant dense<0.000000e+00> : vector<1xf32>
    %152 = vector.multi_reduction <add>, %151, %cst_56 [0] : vector<4x1xf32> to vector<1xf32>
    %153 = vector.shape_cast %152 : vector<1xf32> to vector<1x1xf32>
    %154 = vector.broadcast %153 : vector<1x1xf32> to vector<4x1xf32>
    %155 = arith.divf %151, %154 : vector<4x1xf32>
    %156 = vector.broadcast %155 : vector<4x1xf32> to vector<4x32xf32>
    %157 = arith.mulf %156, %95 : vector<4x32xf32>
    %cst_57 = arith.constant dense<0.000000e+00> : vector<32xf32>
    %158 = vector.multi_reduction <add>, %157, %cst_57 [0] : vector<4x32xf32> to vector<32xf32>
    %159 = vector.shape_cast %158 : vector<32xf32> to vector<1x32xf32>
    %160 = tpu.concatenate %91, %128, %159 in 1 : vector<1x64xf32>, vector<1x32xf32>, vector<1x32xf32> -> vector<1x128xf32>
    %161 = arith.truncf %160 : vector<1x128xf32> to vector<1x128xbf16>
    %c0_58 = arith.constant 0 : index
    %c0_59 = arith.constant 0 : index
    %162 = vector.load %arg16[%c0_58, %c0_59] : memref<128x64xbf16, #tpu.memory_space<vmem>>, vector<128x64xbf16>
    %cst_60 = arith.constant dense<0.000000e+00> : vector<1x64xf32>
    %163 = tpu.matmul %161, %162, %cst_60 {dimension_numbers = #tpu.dot_dimension_numbers<[1], [0], [0], [1], [0, 0, 1, 1], [], []>} : vector<1x128xbf16>, vector<128x64xbf16>, vector<1x64xf32> -> vector<1x64xf32>
    %c0_61 = arith.constant 0 : index
    %c0_62 = arith.constant 0 : index
    %164 = vector.load %arg17[%c0_61, %c0_62] : memref<1x64xf32, #tpu.memory_space<vmem>>, vector<1x64xf32>
    %165 = arith.addf %163, %164 : vector<1x64xf32>
    %166 = math.tanh %165 : vector<1x64xf32>
    %167 = arith.truncf %166 : vector<1x64xf32> to vector<1x64xbf16>
    %c0_63 = arith.constant 0 : index
    %c0_64 = arith.constant 0 : index
    %168 = vector.load %arg18[%c0_63, %c0_64] : memref<64x32xbf16, #tpu.memory_space<vmem>>, vector<64x32xbf16>
    %cst_65 = arith.constant dense<0.000000e+00> : vector<1x32xf32>
    %169 = tpu.matmul %167, %168, %cst_65 {dimension_numbers = #tpu.dot_dimension_numbers<[1], [0], [0], [1], [0, 0, 1, 1], [], []>} : vector<1x64xbf16>, vector<64x32xbf16>, vector<1x32xf32> -> vector<1x32xf32>
    %c0_66 = arith.constant 0 : index
    %c0_67 = arith.constant 0 : index
    %170 = vector.load %arg19[%c0_66, %c0_67] : memref<1x32xf32, #tpu.memory_space<vmem>>, vector<1x32xf32>
    %171 = arith.addf %169, %170 : vector<1x32xf32>
    %172 = math.tanh %171 : vector<1x32xf32>
    %173 = arith.truncf %172 : vector<1x32xf32> to vector<1x32xbf16>
    %c0_68 = arith.constant 0 : index
    %c0_69 = arith.constant 0 : index
    %174 = vector.load %arg20[%c0_68, %c0_69] : memref<32x32xbf16, #tpu.memory_space<vmem>>, vector<32x32xbf16>
    %cst_70 = arith.constant dense<0.000000e+00> : vector<1x32xf32>
    %175 = tpu.matmul %173, %174, %cst_70 {dimension_numbers = #tpu.dot_dimension_numbers<[1], [0], [0], [1], [0, 0, 1, 1], [], []>} : vector<1x32xbf16>, vector<32x32xbf16>, vector<1x32xf32> -> vector<1x32xf32>
    %c0_71 = arith.constant 0 : index
    %c0_72 = arith.constant 0 : index
    %176 = vector.load %arg21[%c0_71, %c0_72] : memref<1x32xf32, #tpu.memory_space<vmem>>, vector<1x32xf32>
    %177 = arith.addf %175, %176 : vector<1x32xf32>
    %178 = math.tanh %177 : vector<1x32xf32>
    %179 = arith.truncf %178 : vector<1x32xf32> to vector<1x32xbf16>
    %c0_73 = arith.constant 0 : index
    %c0_74 = arith.constant 0 : index
    %180 = vector.load %arg22[%c0_73, %c0_74] : memref<32x4xbf16, #tpu.memory_space<vmem>>, vector<32x4xbf16>
    %cst_75 = arith.constant dense<0.000000e+00> : vector<1x4xf32>
    %181 = tpu.matmul %179, %180, %cst_75 {dimension_numbers = #tpu.dot_dimension_numbers<[1], [0], [0], [1], [0, 0, 1, 1], [], []>} : vector<1x32xbf16>, vector<32x4xbf16>, vector<1x4xf32> -> vector<1x4xf32>
    %c0_76 = arith.constant 0 : index
    %c0_77 = arith.constant 0 : index
    %182 = vector.load %arg23[%c0_76, %c0_77] : memref<1x4xf32, #tpu.memory_space<vmem>>, vector<1x4xf32>
    %183 = arith.addf %181, %182 : vector<1x4xf32>
    %184 = arith.negf %183 : vector<1x4xf32>
    %185 = math.exp %184 : vector<1x4xf32>
    %cst_78 = arith.constant 1.000000e+00 : f32
    %186 = vector.broadcast %cst_78 : f32 to vector<1x4xf32>
    %187 = arith.addf %186, %185 : vector<1x4xf32>
    %188 = arith.divf %186, %187 : vector<1x4xf32>
    %c0_79 = arith.constant 0 : index
    %c0_80 = arith.constant 0 : index
    %189 = vector.load %arg24[%c0_79, %c0_80] : memref<1x4xf32, #tpu.memory_space<vmem>>, vector<1x4xf32>
    tpu.vector_store %arg24[%c0_79, %c0_80], %188 {strides = array<i32>} : memref<1x4xf32, #tpu.memory_space<vmem>>, vector<1x4xf32>,
    return
  }
}

</mosaic_0001>

<bundles_post_ra>
// kernel: tpu_custom_call.1
= control target key start
LH: loop header
LB: loop body
LE: loop exit
PB: predicated region body
PF: predicated region fallthrough
CT: control target
= control target key end

     0   :  { %s2171_s0 = inlined_call_operand.vmem [shape: bf16[4,32], index: 0, kind: input, shape index: {}]   ;;  %s2172_s1 = inlined_call_operand.vmem [shape: bf16[32,256], index: 1, kind: input, shape index: {}]   ;;  %s2173_s2 = inlined_call_operand.vmem [shape: bf16[64,256], index: 2, kind: input, shape index: {}]   ;;  %s2174_s3 = inlined_call_operand.vmem [shape: f32[1,256], index: 3, kind: input, shape index: {}]   ;;  %s2175_s4 = inlined_call_operand.vmem [shape: f32[1,64], index: 4, kind: input, shape index: {}]   ;;  %s2176_s5 = inlined_call_operand.vmem [shape: f32[1,64], index: 5, kind: input, shape index: {}]   ;;  %s2177_s6 = inlined_call_operand.vmem [shape: bf16[32,16], index: 6, kind: input, shape index: {}]   ;;  %s2178_s7 = inlined_call_operand.vmem [shape: bf16[32,16], index: 7, kind: input, shape index: {}]   ;;  %s2179_s8 = inlined_call_operand.vmem [shape: f32[1,16], index: 8, kind: input, shape index: {}]   ;;  %s2180_s9 = inlined_call_operand.vmem [shape: bf16[16,1], index: 9, kind: input, shape index: {}]   ;;  %s2181_s10 = inlined_call_operand.<no memory space> [shape: f32[1,1], index: 10, kind: input, shape index: {}]   ;;  %s2182_s11 = inlined_call_operand.vmem [shape: bf16[32,16], index: 11, kind: input, shape index: {}]   ;;  %s2183_s12 = inlined_call_operand.vmem [shape: bf16[32,16], index: 12, kind: input, shape index: {}]   ;;  %s2184_s13 = inlined_call_operand.vmem [shape: f32[1,16], index: 13, kind: input, shape index: {}]   ;;  %s2185_s14 = inlined_call_operand.vmem [shape: bf16[16,1], index: 14, kind: input, shape index: {}]   ;;  %s2186_s16 = inlined_call_operand.vmem [shape: bf16[128,64], index: 16, kind: input, shape index: {}]   ;;  %s2187_s17 = inlined_call_operand.vmem [shape: f32[1,64], index: 17, kind: input, shape index: {}]   ;;  %s2188_s18 = inlined_call_operand.vmem [shape: bf16[64,32], index: 18, kind: input, shape index: {}]   ;;  %s2189_s19 = inlined_call_operand.vmem [shape: f32[1,32], index: 19, kind: input, shape index: {}]   ;;  %s2190_s20 = inlined_call_operand.vmem [shape: bf16[32,32], index: 20, kind: input, shape index: {}]   ;;  %s2191_s21 = inlined_call_operand.vmem [shape: f32[1,32], index: 21, kind: input, shape index: {}]   ;;  %s2192_s22 = inlined_call_operand.vmem [shape: bf16[32,4], index: 22, kind: input, shape index: {}]   ;;  %s2193_s23 = inlined_call_operand.vmem [shape: f32[1,4], index: 23, kind: input, shape index: {}]   ;;  %s2194_s24 = inlined_call_operand.hbm [shape: f32[1,4], index: 24, kind: output, shape index: {}]   ;;  %s2195_s15 = inlined_call_operand.<no memory space> [shape: f32[1,1], index: 15, kind: input, shape index: {}]  }
   0x1   :  { %2200 = sst [smem:[#allocation8_spill]] %s2171_s0  ;;  %v29_v0 = vstv %s2181_s10  ;;  %v31_v1 = vstv %s2195_s15 }
   0x2   :  { %2201 = sst [smem:[#allocation9_spill]] %s2172_s1  ;;  %30 = vst [vmem:[#allocation3] sm:$0x1] %v29_v0  ;;  %32 = vst [vmem:[#allocation4] sm:$0x1] %v31_v1 }
   0x3   :  { %2202 = sst [smem:[#allocation10_spill]] %s2173_s2 }
   0x4   :  { %2203 = sst [smem:[#allocation11_spill]] %s2174_s3 }
   0x5   :  { %2204 = sst [smem:[#allocation12_spill]] %s2175_s4 }
   0x6   :  { %2205 = sst [smem:[#allocation13_spill]] %s2176_s5 }
   0x7   :  { %2206 = sst [smem:[#allocation14_spill]] %s2177_s6 }
   0x8   :  { %2207 = sst [smem:[#allocation15_spill]] %s2178_s7 }
   0x9   :  { %2208 = sst [smem:[#allocation16_spill]] %s2179_s8 }
   0xa   :  { %s2209_s29 = sld [smem:[#allocation10_spill]]  ;;  %v1718_v4 = vmov 0   ;;  %s2210_s15 = sld [smem:[#allocation9_spill]]  ;;  %vm120_vm0 = vcmask 261120   ;;  %vm216_vm1 = vcmask 523264  }
   0xb   :  { %156 = vmatprep.mubr.bf16.mxu0 %v1718_v4  ;;  %252 = vmatprep.mubr.bf16.mxu1 %v1718_v4  ;;  %s2211_s25 = sld [smem:[#allocation8_spill]]  ;;  %s2212_s27 = sld [smem:[#allocation12_spill]] }
   0xc   :  { %1578 = vset.pattern.permute.xlu1 %v1718_v4  ;;  %1579 = vset.pattern.permute.xlu0 %v1718_v4 }
  0x10   :  { %v1580_v2 = vld [vmem:[%s2209_s29 + $0x4] ss:$8 sps:$4 sm:$0xff]   ;;  %v1862_v3 = vld [vmem:[%s2209_s29] ss:$8 sps:$4 sm:$0xff]   ;;  %v1877_v7 = vld [vmem:[%s2209_s29 + $0x14] ss:$8 sps:$4 sm:$0xff]  }
  0x11   :  { %220 = vmatprep.subr.bf16.mxu1 %v1580_v2  ;;  %v1583_v5 = vld [vmem:[%s2210_s15 + $0x4] ss:$8 sps:$4 sm:$0xff]   ;;  %v1585_v6 = vld [vmem:[%s2210_s15] ss:$8 sps:$4 sm:$0xff]   ;;  %v1882_v8 = vld [vmem:[%s2209_s29 + $0x10] ss:$8 sps:$4 sm:$0xff]  }
  0x12   :  { %221 = vmatpush1.bf16.msra.mxu1 %v1862_v3  ;;  %124 = vmatprep.subr.bf16.mxu0 %v1583_v5  ;;  %v1589_v9 = vld [vmem:[%s2210_s15 + $0x14] ss:$8 sps:$4 sm:$0xff]   ;;  %v1591_v10 = vld [vmem:[%s2210_s15 + $0x10] ss:$8 sps:$4 sm:$0xff]   ;;  %v1895_v11 = vld [vmem:[%s2209_s29 + $0x24] ss:$8 sps:$4 sm:$0xff]  }
  0x13   :  { %125 = vmatpush1.bf16.msra.mxu0 %v1585_v6  ;;  %222 = vmatprep.subr.bf16.mxu1 %v1877_v7  ;;  %v1901_v12 = vld [vmem:[%s2209_s29 + $0x20] ss:$8 sps:$4 sm:$0xff]   ;;  %v1910_v14 = vld [vmem:[%s2209_s29 + $0x34] ss:$8 sps:$4 sm:$0xff]   ;;  %v1915_v15 = vld [vmem:[%s2209_s29 + $0x30] ss:$8 sps:$4 sm:$0xff]  }
  0x14   :  { %126 = vmatprep.subr.bf16.mxu0 %v1589_v9  ;;  %v83_v13 = vld [vmem:[%s2211_s25] sm:$0x3] }
  0x15   :  { %v173_v16 = vld [vmem:[%s2212_s27] sm:$0x1] }
  0x16   :  { %223 = vmatpush1.bf16.msra.mxu1 %v1882_v8  ;;  %v175_v17 = vpack.c.bf16 %v173_v16, %v173_v16 }
  0x17   :  { %224 = vmatprep.subr.bf16.mxu1 %v1895_v11  ;;  %127 = vmatpush1.bf16.msra.mxu0 %v1591_v10 }
  0x18   :  { %307 = vmatprep.subr.bf16.mxu0 %v1580_v2 }
  0x1a   :  { %225 = vmatpush1.bf16.msra.mxu1 %v1901_v12  ;;  %1381 = vmatmul.mubr.msk.bf16.vlgmr.msra.gmra.mrb[0].mxu0 %vm120_vm0, %v83_v13 }
  0x1b   :  { %226 = vmatprep.subr.bf16.mxu1 %v1910_v14  ;;  %308 = vmatpush1.bf16.msra.mxu0 %v1862_v3 }
  0x1c   :  { %339 = vmatprep.mubr.bf16.mxu0 %v1718_v4  ;;  %309 = vmatprep.subr.bf16.mxu0 %v1877_v7 }
  0x1e   :  { %227 = vmatpush1.bf16.msra.mxu1 %v1915_v15 }
  0x1f   :  { %398 = vmatprep.subr.bf16.mxu1 %v1580_v2  ;;  %310 = vmatpush1.bf16.msra.mxu0 %v1882_v8 }
  0x20   :  { %311 = vmatprep.subr.bf16.mxu0 %v1895_v11 }
  0x21   :  { %1390 = vmatmul.mubr.msk.bf16.vlgmr.msra.gmra.mrb[0].mxu1 %vm216_vm1, %v175_v17 }
  0x22   :  { %399 = vmatpush1.bf16.msra.mxu1 %v1862_v3  ;;  %430 = vmatprep.mubr.bf16.mxu1 %v1718_v4 }
  0x23   :  { %400 = vmatprep.subr.bf16.mxu1 %v1877_v7  ;;  %312 = vmatpush1.bf16.msra.mxu0 %v1901_v12 }
  0x24   :  { %313 = vmatprep.subr.bf16.mxu0 %v1910_v14 }
  0x26   :  { %401 = vmatpush1.bf16.msra.mxu1 %v1882_v8 }
  0x27   :  { %402 = vmatprep.subr.bf16.mxu1 %v1895_v11  ;;  %314 = vmatpush1.bf16.msra.mxu0 %v1915_v15 }
  0x28   :  { %488 = vmatprep.subr.bf16.mxu0 %v1580_v2 }
  0x29   :  { %33 = vsyncpa [#allocation6], 0  ;;  %v90_v18 = vlaneseq  ;;  %s2213_s6 = sld [smem:[#allocation11_spill]]  ;;  %s1719_s2 = smov 64   ;;  %vm301_vm2 = vcmask 516096   ;;  %vm389_vm3 = vcmask 517121  }
  0x2a   :  { %403 = vmatpush1.bf16.msra.mxu1 %v1901_v12  ;;  %s2214_s10 = sld [smem:[#allocation13_spill]]  ;;  %vm480_vm4 = vcmask 518146   ;;  %s2215_s25 = sld [smem:[#allocation14_spill]]  ;;  %vm1721_vm5 = vmmov 0   ;;  %vm570_vm6 = vcmask 519171   ;;  %vm729_vm7 = vcmask 130048  }
  0x2b   :  { %404 = vmatprep.subr.bf16.mxu1 %v1910_v14  ;;  %v91_v19 = vshrl.u32 %v90_v18, 7  ;;  %s2216_s5 = sld [smem:[#allocation15_spill]]  ;;  %s1722_s29 = smov 96   ;;  %vm773_vm8 = vcmask 3072   ;;  %vm799_vm9 = vcmask 519424   ;;  %vm1040_vm10 = vcmask 785408  }
  0x2c   :  { %vm1361_vm11 = vcmask 24576  }
  0x2d   :  { %v96_v20 = vsub.s32 1, %v91_v19  ;;  %v1952_v35 = vsub.s32 0, %v91_v19 }
  0x2e   :  { %405 = vmatpush1.bf16.msra.mxu1 %v1915_v15 }
  0x2f   :  { %v88_v21 = vld [vmem:[%s2213_s6] sm:$0x3] }
  0x30   :  { %v97_v23 = vrot.slane %v88_v21, %v96_v20  ;;  %v1393_v34 = vld [vmem:[%s2214_s10] ss:$0 sm:$0xff]  ;;  %v93_v36 = vrot.slane %v88_v21, %v1952_v35 }
  0xed   :  { %v158_v22 = vpop.f32.mrb[0].mxu0 }
  0xee   :  { %v160_v24 = vpop.f32.mrb[1].mxu0  ;;  %v1955_v37 = vadd.f32 %v158_v22, %v93_v36 }
  0xef   :  { %v162_v25 = vpop.f32.mrb[2].mxu0  ;;  %v1944_v27 = vadd.f32 %v160_v24, %v97_v23 }
  0xf0   :  { %v163_v26 = vpop.f32.mrb[3].mxu0 }
  0xf4   :  { %v254_v28 = vpop.f32.mrb[0].mxu1 }
  0xf5   :  { %v256_v29 = vpop.f32.mrb[1].mxu1  ;;  %v261_v38 = vadd.f32 %v254_v28, %v1955_v37 }
  0xf6   :  { %v262_v30 = vadd.f32 %v256_v29, %v1944_v27  ;;  %v258_v31 = vpop.f32.mrb[2].mxu1 }
  0xf7   :  { %v259_v32 = vpop.f32.mrb[3].mxu1  ;;  %v1391_v39 = vmul.f32 -1.442695, %v261_v38 }
  0xf8   :  { %1624 = vtanh.f32 %v262_v30  ;;  %v1392_v50 = vmul.f32 -1.442695, %v262_v30 }
  0xf9   :  { %1626 = vpow2.f32 %v1391_v39 }
 0x102   :  { %v1625_v33 = vpop.eup %1624 }
 0x103   :  { %286 = vrot.lane.b32.xlu0 %v1625_v33, %s1719_s2  ;;  %v1627_v40 = vpop.eup %1626 }
 0x104   :  { %v269_v41 = vadd.f32 1.0, %v1627_v40 }
 0x106   :  { %1628 = vrcp.f32 %v269_v41 }
 0x107   :  { %281 = vrot.lane.b32.xlu0 %v1393_v34, %s1719_s2 }
 0x110   :  { %v1629_v42 = vpop.eup %1628 }
 0x175   :  { %v287_v43 = vpop.permute.xlu0 %286 }
 0x176   :  { %v289_v44 = vmul.f32 %v1629_v42, %v287_v43 }
 0x178   :  { %291 = vrot.lane.b32.xlu1 %v289_v44, %s1719_s2 }
 0x179   :  { %v282_v45 = vpop.permute.xlu0 %281 }
 0x17a   :  { %v284_v46 = vmul.f32 %v1629_v42, %v282_v45 }
 0x1ea   :  { %v292_v47 = vpop.permute.xlu1 %291 }
 0x1eb   :  { %v294_v48 = vadd.f32 %v292_v47, %v284_v46 }
 0x1ed   :  { %1630 = vtanh.f32 %v294_v48 }
 0x1ee   :  { %1632 = vpow2.f32 %v1392_v50 }
 0x1f7   :  { %v1631_v49 = vpop.eup %1630 }
 0x1f8   :  { %297 = vrot.lane.b32.xlu1 %v1631_v49, %s1719_s2  ;;  %v1633_v51 = vpop.eup %1632 }
 0x1f9   :  { %v270_v52 = vadd.f32 1.0, %v1633_v51 }
 0x1fb   :  { %1634 = vrcp.f32 %v270_v52 }
 0x205   :  { %v1635_v53 = vpop.eup %1634 }
 0x26a   :  { %v298_v54 = vpop.permute.xlu1 %297 }
 0x26b   :  { %v300_v55 = vmul.f32 %v1635_v53, %v298_v54 }
 0x26d   :  { %302 = vst.msk [vmem:[#allocation2] sm:$0x1] %vm301_vm2, %v300_v55  ;;  %v303_v56 = vpack.c.bf16 %v300_v55, %v300_v55 }
 0x26f   :  { %1394 = vmatmul.mubr.msk.bf16.vlgmr.msra.gmra.mrb[4].mxu0 %vm216_vm1, %v303_v56 }
 0x270   :  { %489 = vmatpush1.bf16.msra.mxu0 %v1862_v3  ;;  %520 = vmatprep.mubr.bf16.mxu0 %v1718_v4 }
 0x271   :  { %490 = vmatprep.subr.bf16.mxu0 %v1877_v7 }
 0x274   :  { %491 = vmatpush1.bf16.msra.mxu0 %v1882_v8  ;;  %v370_v8 = vrot.slane %v294_v48, 7 }
 0x275   :  { %492 = vmatprep.subr.bf16.mxu0 %v1895_v11 }
 0x278   :  { %493 = vmatpush1.bf16.msra.mxu0 %v1901_v12 }
 0x279   :  { %494 = vmatprep.subr.bf16.mxu0 %v1910_v14 }
 0x27c   :  { %495 = vmatpush1.bf16.msra.mxu0 %v1915_v15 }
 0x342   :  { %v341_v57 = vpop.f32.mrb[4].mxu0 }
 0x343   :  { %v343_v58 = vpop.f32.mrb[5].mxu0  ;;  %v350_v0 = vrot.slane %v341_v57, 7 }
 0x344   :  { %v351_v59 = vrot.slane %v343_v58, 7  ;;  %v345_v60 = vpop.f32.mrb[6].mxu0 }
 0x345   :  { %v346_v61 = vpop.f32.mrb[7].mxu0  ;;  %v354_v1 = vadd.f32 %v350_v0, %v1955_v37 }
 0x346   :  { %v355_v62 = vadd.f32 %v351_v59, %v1944_v27 }
 0x347   :  { %v1395_v2 = vmul.f32 -1.442695, %v354_v1 }
 0x348   :  { %1636 = vtanh.f32 %v355_v62  ;;  %v1396_v13 = vmul.f32 -1.442695, %v355_v62 }
 0x349   :  { %1638 = vpow2.f32 %v1395_v2 }
 0x352   :  { %v1637_v63 = vpop.eup %1636 }
 0x353   :  { %374 = vrot.lane.b32.xlu0 %v1637_v63, %s1719_s2  ;;  %v1639_v3 = vpop.eup %1638 }
 0x354   :  { %v362_v4 = vadd.f32 1.0, %v1639_v3 }
 0x356   :  { %1640 = vrcp.f32 %v362_v4 }
 0x360   :  { %v1641_v5 = vpop.eup %1640 }
 0x361   :  { %v372_v9 = vmul.f32 %v1641_v5, %v370_v8 }
 0x3c5   :  { %v375_v6 = vpop.permute.xlu0 %374 }
 0x3c6   :  { %v377_v7 = vmul.f32 %v1641_v5, %v375_v6  ;;  %v1598_v5 = vld [vmem:[%s2215_s25] sm:$0xff]  }
 0x3c8   :  { %379 = vrot.lane.b32.xlu1 %v377_v7, %s1719_s2  ;;  %v1720_v7 = vmov 0.0  }
 0x3c9   :  { %1479 = vmatprep.subr.bf16.mxu1 %v1720_v7  ;;  %1487 = vmatprep.subr.bf16.mxu0 %v1720_v7 }
 0x43a   :  { %v380_v10 = vpop.permute.xlu1 %379 }
 0x43b   :  { %v382_v11 = vadd.f32 %v380_v10, %v372_v9  ;;  %v1600_v9 = vld [vmem:[%s2216_s5] sm:$0xff]  }
 0x43d   :  { %1642 = vtanh.f32 %v382_v11  ;;  %v461_v39 = vrot.slane %v382_v11, 7 }
 0x43e   :  { %1644 = vpow2.f32 %v1396_v13  ;;  %v1601_v13 = vld [vmem:[%s2216_s5 + $0x8] sm:$0xff]  }
 0x447   :  { %v1643_v12 = vpop.eup %1642 }
 0x448   :  { %385 = vrot.lane.b32.xlu0 %v1643_v12, %s1719_s2  ;;  %v1645_v14 = vpop.eup %1644 }
 0x449   :  { %v363_v15 = vadd.f32 1.0, %v1645_v14 }
 0x44b   :  { %1646 = vrcp.f32 %v363_v15 }
 0x455   :  { %v1647_v16 = vpop.eup %1646 }
 0x4ba   :  { %v386_v17 = vpop.permute.xlu0 %385 }
 0x4bb   :  { %v388_v18 = vmul.f32 %v1647_v16, %v386_v17 }
 0x4bd   :  { %390 = vst.msk [vmem:[#allocation2] sm:$0x2] %vm389_vm3, %v388_v18  ;;  %v391_v19 = vpack.c.bf16 %v388_v18, %v388_v18 }
 0x4bf   :  { %v393_v20 = vshrl.u32 %v391_v19, 16 }
 0x4c1   :  { %1397 = vmatmul.mubr.msk.bf16.vlgmr.msra.gmra.mrb[4].mxu1 %vm216_vm1, %v393_v20 }
 0x4c2   :  { %1480 = vmatpush3.bf16.msra.mxu1 %v1598_v5  ;;  %1483 = vmatprep.mubr.msk.bf16.mxu1 %vm1721_vm5, %v1720_v7 }
 0x4c3   :  { %1481 = vmatprep.subr.bf16.mxu1 %v1720_v7 }
 0x594   :  { %v432_v21 = vpop.f32.mrb[4].mxu1 }
 0x595   :  { %v434_v22 = vpop.f32.mrb[5].mxu1  ;;  %v441_v29 = vrot.slane %v432_v21, 6 }
 0x596   :  { %v442_v23 = vrot.slane %v434_v22, 6  ;;  %v436_v24 = vpop.f32.mrb[6].mxu1  ;;  %v1602_v22 = vld [vmem:[%s2182_s11] sm:$0xff]  }
 0x597   :  { %v437_v25 = vpop.f32.mrb[7].mxu1  ;;  %v445_v30 = vadd.f32 %v441_v29, %v1955_v37  ;;  %v1603_v24 = vld [vmem:[%s2182_s11 + $0x8] sm:$0xff]  }
 0x598   :  { %v446_v26 = vadd.f32 %v442_v23, %v1944_v27 }
 0x599   :  { %v1398_v31 = vmul.f32 -1.442695, %v445_v30 }
 0x59a   :  { %1648 = vtanh.f32 %v446_v26  ;;  %v1399_v44 = vmul.f32 -1.442695, %v446_v26 }
 0x59b   :  { %1650 = vpow2.f32 %v1398_v31  ;;  %v1604_v31 = vld [vmem:[%s2180_s9] sm:$0xff]  }
 0x5a4   :  { %v1649_v28 = vpop.eup %1648 }
 0x5a5   :  { %465 = vrot.lane.b32.xlu1 %v1649_v28, %s1719_s2  ;;  %v1651_v32 = vpop.eup %1650 }
 0x5a6   :  { %v453_v33 = vadd.f32 1.0, %v1651_v32 }
 0x5a8   :  { %1652 = vrcp.f32 %v453_v33 }
 0x5b2   :  { %v1653_v34 = vpop.eup %1652 }
 0x5b3   :  { %v463_v40 = vmul.f32 %v1653_v34, %v461_v39 }
 0x617   :  { %v466_v36 = vpop.permute.xlu1 %465 }
 0x618   :  { %v468_v38 = vmul.f32 %v1653_v34, %v466_v36 }
 0x61a   :  { %470 = vrot.lane.b32.xlu0 %v468_v38, %s1719_s2 }
 0x68c   :  { %v471_v41 = vpop.permute.xlu0 %470 }
 0x68d   :  { %v473_v42 = vadd.f32 %v471_v41, %v463_v40 }
 0x68f   :  { %1654 = vtanh.f32 %v473_v42  ;;  %v551_v3 = vrot.slane %v473_v42, 7 }
 0x690   :  { %1656 = vpow2.f32 %v1399_v44 }
 0x699   :  { %v1655_v43 = vpop.eup %1654 }
 0x69a   :  { %476 = vrot.lane.b32.xlu1 %v1655_v43, %s1719_s2  ;;  %v1657_v45 = vpop.eup %1656 }
 0x69b   :  { %v454_v46 = vadd.f32 1.0, %v1657_v45 }
 0x69d   :  { %1658 = vrcp.f32 %v454_v46 }
 0x6a7   :  { %v1659_v47 = vpop.eup %1658 }
 0x70c   :  { %v477_v48 = vpop.permute.xlu1 %476 }
 0x70d   :  { %v479_v49 = vmul.f32 %v1659_v47, %v477_v48  ;;  %v1605_v47 = vld [vmem:[%s2183_s12] sm:$0xff]  }
 0x70f   :  { %481 = vst.msk [vmem:[#allocation2] sm:$0x4] %vm480_vm4, %v479_v49  ;;  %v482_v50 = vpack.c.bf16 %v479_v49, %v479_v49  ;;  %v1606_v49 = vld [vmem:[%s2183_s12 + $0x8] sm:$0xff]  }
 0x711   :  { %v484_v51 = vrot.slane %v482_v50, 1  ;;  %v1607_v50 = vld [vmem:[%s2185_s14] sm:$0xff]  }
 0x713   :  { %1400 = vmatmul.mubr.msk.bf16.vlgmr.msra.gmra.mrb[8].mxu0 %vm216_vm1, %v484_v51  ;;  %v1410_v51 = vld [vmem:[#allocation3] ss:$0 sm:$0xff] }
 0x714   :  { %1491 = vmatprep.mubr.msk.bf16.mxu0 %vm1721_vm5, %v1720_v7  ;;  %1488 = vmatpush3.bf16.msra.mxu0 %v1600_v9 }
 0x715   :  { %1489 = vmatprep.subr.bf16.mxu0 %v1720_v7 }
 0x718   :  { %1490 = vmatpush3.bf16.msra.mxu0 %v1601_v13 }
 0x719   :  { %1501 = vmatprep.subr.bf16.mxu0 %v1720_v7 }
 0x7e6   :  { %v522_v52 = vpop.f32.mrb[8].mxu0 }
 0x7e7   :  { %v524_v53 = vpop.f32.mrb[9].mxu0  ;;  %v531_v59 = vrot.slane %v522_v52, 5 }
 0x7e8   :  { %v532_v54 = vrot.slane %v524_v53, 5  ;;  %v526_v55 = vpop.f32.mrb[10].mxu0 }
 0x7e9   :  { %v527_v56 = vpop.f32.mrb[11].mxu0  ;;  %v535_v60 = vadd.f32 %v531_v59, %v1955_v37  ;;  %v1599_v37 = vld [vmem:[%s2215_s25 + $0x8] sm:$0xff]   ;;  %s2217_s25 = sld [smem:[#allocation16_spill]] }
 0x7ea   :  { %v536_v57 = vadd.f32 %v532_v54, %v1944_v27  ;;  %1482 = vmatpush3.bf16.msra.mxu1 %v1599_v37 }
 0x7eb   :  { %v1401_v61 = vmul.f32 -1.442695, %v535_v60  ;;  %1495 = vmatprep.subr.bf16.mxu1 %v1720_v7 }
 0x7ec   :  { %1660 = vtanh.f32 %v536_v57  ;;  %v1402_v10 = vmul.f32 -1.442695, %v536_v57 }
 0x7ed   :  { %1662 = vpow2.f32 %v1401_v61 }
 0x7ef   :  { %v1409_v34 = vld [vmem:[%s2217_s25] ss:$0 sm:$0xff] }
 0x7f6   :  { %v1661_v58 = vpop.eup %1660 }
 0x7f7   :  { %555 = vrot.lane.b32.xlu0 %v1661_v58, %s1719_s2  ;;  %v1663_v62 = vpop.eup %1662 }
 0x7f8   :  { %v543_v63 = vadd.f32 1.0, %v1663_v62 }
 0x7fa   :  { %1664 = vrcp.f32 %v543_v63  ;;  %v1419_v63 = vld [vmem:[%s2184_s13] ss:$0 sm:$0xff]  ;;  %s1723_s13 = smov 32  }
 0x804   :  { %v1665_v0 = vpop.eup %1664 }
 0x805   :  { %v553_v4 = vmul.f32 %v1665_v0, %v551_v3 }
 0x869   :  { %v556_v1 = vpop.permute.xlu0 %555 }
 0x86a   :  { %v558_v2 = vmul.f32 %v1665_v0, %v556_v1 }
 0x86c   :  { %560 = vrot.lane.b32.xlu1 %v558_v2, %s1719_s2 }
 0x8de   :  { %v561_v27 = vpop.permute.xlu1 %560 }
 0x8df   :  { %v563_v6 = vadd.f32 %v561_v27, %v553_v4 }
 0x8e1   :  { %1666 = vtanh.f32 %v563_v6 }
 0x8e2   :  { %1668 = vpow2.f32 %v1402_v10 }
 0x8eb   :  { %v1667_v8 = vpop.eup %1666 }
 0x8ec   :  { %566 = vrot.lane.b32.xlu0 %v1667_v8, %s1719_s2  ;;  %v1669_v11 = vpop.eup %1668 }
 0x8ed   :  { %v544_v12 = vadd.f32 1.0, %v1669_v11 }
 0x8ef   :  { %1670 = vrcp.f32 %v544_v12 }
 0x8f9   :  { %v1671_v14 = vpop.eup %1670 }
 0x95e   :  { %v567_v15 = vpop.permute.xlu0 %566 }
 0x95f   :  { %v2008_v16 = vmul.f32 %v1671_v14, %v567_v15 }
 0x961   :  { %571 = vst.msk [vmem:[#allocation2] sm:$0x8] %vm570_vm6, %v2008_v16  ;;  %v573_v17 = vpack.c.bf16 %v2008_v16, %v2008_v16 }
 0x963   :  { %v579_v18 = vshrl.u32 %v573_v17, 16 }
 0x965   :  { %v581_v19 = vrot.slane %v579_v18, 1 }
 0x967   :  { %811 = vrot.lane.b32.xlu0 %v581_v19, %s1722_s29  ;;  %1484 = vmatmul.mubr.msk.bf16.vlgmr.msra.gmra.mrb[8].mxu1 %vm120_vm0, %v581_v19 }
 0x968   :  { %v2014_v20 = vld [vmem:[#allocation2] sm:$0xf]  ;;  %1497 = vmatprep.mubr.msk.bf16.mxu1 %vm1721_vm5, %v1720_v7  ;;  %1496 = vmatpush3.bf16.msra.mxu1 %v1604_v31 }
 0x969   :  { %v637_v21 = vpack.c.bf16 %v2014_v20, %v2014_v20  ;;  %1509 = vmatprep.subr.bf16.mxu1 %v1720_v7 }
 0x96b   :  { %647 = vrot.lane.b32.xlu1 %v637_v21, %s1722_s29 }
 0x9d9   :  { %v812_v25 = vpop.permute.xlu0 %811 }
 0x9dd   :  { %v648_v23 = vpop.permute.xlu1 %647 }
 0x9de   :  { %1492 = vmatmul.mubr.msk.bf16.vlgmr.msra.gmra.mrb[12].mxu0 %vm120_vm0, %v648_v23 }
 0x9df   :  { %1502 = vmatpush3.bf16.msra.mxu0 %v1602_v22  ;;  %1505 = vmatprep.mubr.msk.bf16.mxu0 %vm1721_vm5, %v1720_v7 }
 0x9e0   :  { %1503 = vmatprep.subr.bf16.mxu0 %v1720_v7 }
 0x9e3   :  { %1504 = vmatpush3.bf16.msra.mxu0 %v1603_v24 }
 0x9e4   :  { %1517 = vmatprep.subr.bf16.mxu0 %v1720_v7 }
 0x9e6   :  { %1506 = vmatmul.mubr.msk.bf16.vlgmr.msra.gmra.mrb[16].mxu0 %vm120_vm0, %v812_v25 }
 0x9e7   :  { %1519 = vmatprep.mubr.msk.bf16.mxu0 %vm1721_vm5, %v1720_v7  ;;  %1518 = vmatpush3.bf16.msra.mxu0 %v1607_v50 }
 0x9e8   :  { %1543 = vmatprep.subr.bf16.mxu0 %v1720_v7 }
 0xa3a   :  { %v631_v26 = vpop.f32.mrb[8].mxu1 }
 0xa3b   :  { %v1485_v28 = vpop.f32.mrb[9].mxu1  ;;  %v645_v32 = vrot.slane %v631_v26, %v1952_v35 }
 0xa3c   :  { %v634_v29 = vpop.f32.mrb[10].mxu1 }
 0xa3d   :  { %v1486_v30 = vpop.f32.mrb[11].mxu1 }
 0xab1   :  { %v698_v33 = vpop.f32.mrb[12].mxu0 }
 0xab2   :  { %v699_v36 = vadd.f32 %v698_v33, %v645_v32  ;;  %v1493_v38 = vpop.f32.mrb[13].mxu0  ;;  %v1420_v32 = vld [vmem:[#allocation4] ss:$0 sm:$0xff] }
 0xab3   :  { %v701_v39 = vpop.f32.mrb[14].mxu0 }
 0xab4   :  { %v711_v40 = vadd.f32 %v1409_v34, %v699_v36  ;;  %v1494_v41 = vpop.f32.mrb[15].mxu0 }
 0xab6   :  { %1672 = vtanh.f32 %v711_v40 }
 0xab9   :  { %v862_v42 = vpop.f32.mrb[16].mxu0 }
 0xaba   :  { %v1507_v43 = vpop.f32.mrb[17].mxu0  ;;  %v875_v60 = vrot.slane %v862_v42, %v1952_v35 }
 0xabb   :  { %v865_v44 = vpop.f32.mrb[18].mxu0 }
 0xabc   :  { %v1508_v45 = vpop.f32.mrb[19].mxu0 }
 0xac0   :  { %v1673_v46 = vpop.eup %1672 }
 0xac1   :  { %v713_v48 = vpack.c.bf16 %v1673_v46, %v1673_v46 }
 0xac3   :  { %1498 = vmatmul.mubr.msk.bf16.vlgmr.msra.gmra.mrb[12].mxu1 %vm729_vm7, %v713_v48 }
 0xac4   :  { %1510 = vmatpush3.bf16.msra.mxu1 %v1605_v47  ;;  %1513 = vmatprep.mubr.msk.bf16.mxu1 %vm1721_vm5, %v1720_v7 }
 0xac5   :  { %1511 = vmatprep.subr.bf16.mxu1 %v1720_v7 }
 0xac8   :  { %1512 = vmatpush3.bf16.msra.mxu1 %v1606_v49 }
 0xac9   :  { %1523 = vmatprep.subr.bf16.mxu1 %v1720_v7 }
 0xacb   :  { %1514 = vmatmul.mubr.msk.bf16.vlgmr.msra.gmra.mrb[16].mxu1 %vm120_vm0, %v637_v21 }
 0xacc   :  { %1539 = vmatprep.mubr.msk.bf16.mxu1 %vm1721_vm5, %v1720_v7 }
 0xb96   :  { %v767_v52 = vpop.f32.mrb[12].mxu1 }
 0xb97   :  { %v768_v53 = vadd.f32 %v1410_v51, %v767_v52  ;;  %v1499_v54 = vpop.f32.mrb[13].mxu1 }
 0xb98   :  { %v770_v55 = vpop.f32.mrb[14].mxu1 }
 0xb99   :  { %v774_v56 = vsel %vm773_vm8, %v768_v53, -inf  ;;  %v1500_v57 = vpop.f32.mrb[15].mxu1 }
 0xb9a   :  { %v775_v58 = vrot.slane %v774_v56, 4 }
 0xb9c   :  { %v776_v59 = vmax.f32 %v774_v56, %v775_v58 }
 0xb9e   :  { %v777_v61 = vrot.slane %v776_v59, 2  ;;  %v925_v62 = vpop.f32.mrb[16].mxu1 }
 0xb9f   :  { %v926_v0 = vadd.f32 %v925_v62, %v875_v60  ;;  %v1515_v1 = vpop.f32.mrb[17].mxu1  ;;  %v1609_v60 = vld [vmem:[%s2186_s16 + $0x8] sm:$0xff]   ;;  %v1611_v62 = vld [vmem:[%s2186_s16 + $0x18] sm:$0xff]  }
 0xba0   :  { %v778_v2 = vmax.f32 %v776_v59, %v777_v61  ;;  %v928_v3 = vpop.f32.mrb[18].mxu1  ;;  %v1608_v59 = vld [vmem:[%s2186_s16] sm:$0xff]   ;;  %v1610_v61 = vld [vmem:[%s2186_s16 + $0x10] sm:$0xff]  }
 0xba1   :  { %v938_v4 = vadd.f32 %v1419_v63, %v926_v0  ;;  %v1516_v27 = vpop.f32.mrb[19].mxu1  ;;  %1524 = vmatpush3.bf16.msra.mxu1 %v1608_v59  ;;  %v1612_v63 = vld [vmem:[%s2186_s16 + $0x20] sm:$0xff]   ;;  %v1613_v0 = vld [vmem:[%s2186_s16 + $0x28] sm:$0xff]   ;;  %v1614_v3 = vld [vmem:[%s2186_s16 + $0x30] sm:$0xff]  }
 0xba2   :  { %v779_v5 = vrot.slane %v778_v2, 1  ;;  %1525 = vmatprep.subr.bf16.mxu1 %v1720_v7 }
 0xba3   :  { %1674 = vtanh.f32 %v938_v4 }
 0xba4   :  { %v780_v6 = vmax.f32 %v778_v2, %v779_v5  ;;  %v1615_v5 = vld [vmem:[%s2186_s16 + $0x38] sm:$0xff]  }
 0xba5   :  { %1526 = vmatpush3.bf16.msra.mxu1 %v1609_v60 }
 0xba6   :  { %v781_v37 = vsub.f32 %v768_v53, %v780_v6  ;;  %1527 = vmatprep.subr.bf16.mxu1 %v1720_v7 }
 0xba8   :  { %v782_v8 = vmul.f32 1.442695, %v781_v37 }
 0xba9   :  { %1528 = vmatpush3.bf16.msra.mxu1 %v1610_v61 }
 0xbaa   :  { %1676 = vpow2.f32 %v782_v8  ;;  %1529 = vmatprep.subr.bf16.mxu1 %v1720_v7 }
 0xbad   :  { %v1675_v9 = vpop.eup %1674  ;;  %1530 = vmatpush3.bf16.msra.mxu1 %v1611_v62 }
 0xbae   :  { %v940_v35 = vpack.c.bf16 %v1675_v9, %v1675_v9  ;;  %1531 = vmatprep.subr.bf16.mxu1 %v1720_v7 }
 0xbb0   :  { %1520 = vmatmul.mubr.msk.bf16.vlgmr.msra.gmra.mrb[20].mxu0 %vm729_vm7, %v940_v35 }
 0xbb1   :  { %1551 = vmatprep.mubr.msk.bf16.mxu0 %vm1721_vm5, %v1720_v7  ;;  %1532 = vmatpush3.bf16.msra.mxu1 %v1612_v63 }
 0xbb2   :  { %1533 = vmatprep.subr.bf16.mxu1 %v1720_v7 }
 0xbb4   :  { %v1677_v10 = vpop.eup %1676 }
 0xbb5   :  { %v784_v11 = vsel %vm773_vm8, %v1677_v10, 0.0  ;;  %1534 = vmatpush3.bf16.msra.mxu1 %v1613_v0 }
 0xbb6   :  { %v785_v12 = vrot.slane %v784_v11, 4  ;;  %1535 = vmatprep.subr.bf16.mxu1 %v1720_v7 }
 0xbb8   :  { %v786_v13 = vadd.f32 %v785_v12, %v784_v11 }
 0xbb9   :  { %1536 = vmatpush3.bf16.msra.mxu1 %v1614_v3 }
 0xbba   :  { %v787_v14 = vrot.slane %v786_v13, 2  ;;  %1537 = vmatprep.subr.bf16.mxu1 %v1720_v7 }
 0xbbc   :  { %v788_v15 = vadd.f32 %v787_v14, %v786_v13 }
 0xbbd   :  { %1538 = vmatpush3.bf16.msra.mxu1 %v1615_v5 }
 0xbbe   :  { %v789_v17 = vrot.slane %v788_v15, 1 }
 0xbc0   :  { %v790_v18 = vadd.f32 %v789_v17, %v788_v15  ;;  %v1616_v17 = vld [vmem:[%s2188_s18] sm:$0xff]  }
 0xbc1   :  { %1544 = vmatpush3.bf16.msra.mxu0 %v1616_v17 }
 0xbc2   :  { %1678 = vrcp.f32 %v790_v18  ;;  %1545 = vmatprep.subr.bf16.mxu0 %v1720_v7  ;;  %v1617_v18 = vld [vmem:[%s2188_s18 + $0x8] sm:$0xff]  }
 0xbc5   :  { %1546 = vmatpush3.bf16.msra.mxu0 %v1617_v18 }
 0xbc6   :  { %1547 = vmatprep.subr.bf16.mxu0 %v1720_v7 }
 0xbcc   :  { %v1679_v19 = vpop.eup %1678 }
 0xbcd   :  { %v792_v21 = vmul.f32 %v1679_v19, %v1677_v10  ;;  %v1619_v19 = vld [vmem:[%s2188_s18 + $0x18] sm:$0xff]  }
 0xbcf   :  { %795 = vperm.xlu1 %1578, %v792_v21   ;;  %v1059_v21 = vld [vmem:[%s2187_s17] sm:$0x1] }
 0xc4e   :  { %v796_v22 = vpop.permute.xlu1 %795 }
 0xc4f   :  { %v798_v23 = vmul.f32 %v796_v22, %v2014_v20 }
 0xc51   :  { %v800_v24 = vsel %vm799_vm9, %v798_v23, 0.0 }
 0xc52   :  { %v801_v25 = vrot.slane %v800_v24, 4 }
 0xc54   :  { %v802_v26 = vadd.f32 %v801_v25, %v800_v24 }
 0xc56   :  { %v803_v28 = vrot.slane %v802_v26, 2 }
 0xc58   :  { %v804_v29 = vadd.f32 %v803_v28, %v802_v26 }
 0xc5a   :  { %v805_v30 = vrot.slane %v804_v29, 1 }
 0xc5c   :  { %v806_v31 = vadd.f32 %v805_v30, %v804_v29  ;;  %v1620_v30 = vld [vmem:[%s2190_s20] sm:$0xff]  }
 0xc5e   :  { %1032 = vrot.lane.b32.xlu1 %v806_v31, %s1723_s13  ;;  %v1621_v31 = vld [vmem:[%s2190_s20 + $0x8] sm:$0xff]  }
 0xc83   :  { %v993_v33 = vpop.f32.mrb[20].mxu0 }
 0xc84   :  { %v994_v34 = vadd.f32 %v1420_v32, %v993_v33  ;;  %v1521_v36 = vpop.f32.mrb[21].mxu0  ;;  %v1163_v32 = vld [vmem:[%s2189_s19] sm:$0x1] }
 0xc85   :  { %v996_v38 = vpop.f32.mrb[22].mxu0 }
 0xc86   :  { %v999_v39 = vsel %vm773_vm8, %v994_v34, -inf  ;;  %v1522_v40 = vpop.f32.mrb[23].mxu0 }
 0xc87   :  { %v1000_v41 = vrot.slane %v999_v39, 4 }
 0xc89   :  { %v1001_v42 = vmax.f32 %v999_v39, %v1000_v41 }
 0xc8b   :  { %v1002_v43 = vrot.slane %v1001_v42, 2 }
 0xc8d   :  { %v1003_v44 = vmax.f32 %v1001_v42, %v1002_v43  ;;  %v1622_v42 = vld [vmem:[%s2192_s22] sm:$0xff]   ;;  %v1623_v43 = vld [vmem:[%s2192_s22 + $0x8] sm:$0xff]  }
 0xc8f   :  { %v1004_v45 = vrot.slane %v1003_v44, 1 }
 0xc91   :  { %v1005_v46 = vmax.f32 %v1003_v44, %v1004_v45  ;;  %v1237_v44 = vld [vmem:[%s2191_s21] sm:$0x1]  ;;  %s1724_s21 = smov [#allocation5]  }
 0xc92   :  { %s1369_s22 = sshll.u32 %s1724_s21, 4  ;;  %s1370_s22 = int_to_ptr.vmem [resolvable:$true] %s1369_s22 }
 0xc93   :  { %v1006_v47 = vsub.f32 %v994_v34, %v1005_v46  ;;  %s1694_s15 = scalar_lea.vmem %s1370_s22, 16  ;;  %s1698_s8 = scalar_lea.vmem %s1370_s22, 32 }
 0xc94   :  { %p1695_p0 = scmp.ne.s32.totalorder %s1370_s22, %s1694_s15  ;;  %p1699_p1 = scmp.lt.s32.totalorder %s1370_s22, %s1370_s22 }
 0xc95   :  { %v1007_v48 = vmul.f32 1.442695, %v1006_v47  ;;  %p1700_p2 = scmp.lt.s32.totalorder %s1698_s8, %s1694_s15 }
 0xc97   :  { %1680 = vpow2.f32 %v1007_v48  ;;  %p1701_p3 = por %p1700_p2, %p1699_p1 }
 0xc99   :  { %p1702_p4 = pnand %p1701_p3, %p1695_p0 }
 0xca1   :  { %v1681_v49 = vpop.eup %1680 }
 0xca2   :  { %v1009_v50 = vsel %vm773_vm8, %v1681_v49, 0.0 }
 0xca3   :  { %v1010_v51 = vrot.slane %v1009_v50, 4 }
 0xca5   :  { %v1011_v52 = vadd.f32 %v1010_v51, %v1009_v50 }
 0xca7   :  { %v1012_v53 = vrot.slane %v1011_v52, 2 }
 0xca9   :  { %v1013_v54 = vadd.f32 %v1012_v53, %v1011_v52 }
 0xcab   :  { %v1014_v55 = vrot.slane %v1013_v54, 1 }
 0xcad   :  { %v1015_v56 = vadd.f32 %v1014_v55, %v1013_v54 }
 0xcaf   :  { %1682 = vrcp.f32 %v1015_v56 }
 0xcb9   :  { %v1683_v57 = vpop.eup %1682 }
 0xcba   :  { %v1017_v58 = vmul.f32 %v1683_v57, %v1681_v49 }
 0xcbc   :  { %1020 = vperm.xlu0 %1579, %v1017_v58  }
 0xcd0   :  { %v1033_v35 = vpop.permute.xlu1 %1032 }
 0xcd1   :  { %v1039_v10 = vsel %vm216_vm1, %v2008_v16, %v1033_v35  ;;  %v1618_v16 = vld [vmem:[%s2188_s18 + $0x10] sm:$0xff]  }
 0xcd2   :  { %1548 = vmatpush3.bf16.msra.mxu0 %v1618_v16 }
 0xcd3   :  { %1549 = vmatprep.subr.bf16.mxu0 %v1720_v7 }
 0xcd6   :  { %1550 = vmatpush3.bf16.msra.mxu0 %v1619_v19 }
 0xcd7   :  { %1555 = vmatprep.subr.bf16.mxu0 %v1720_v7 }
 0xd3b   :  { %v1021_v1 = vpop.permute.xlu0 %1020 }
 0xd3c   :  { %v1023_v2 = vmul.f32 %v1021_v1, %v2014_v20 }
 0xd3e   :  { %v1024_v4 = vsel %vm799_vm9, %v1023_v2, 0.0 }
 0xd3f   :  { %v1025_v27 = vrot.slane %v1024_v4, 4 }
 0xd41   :  { %v1026_v6 = vadd.f32 %v1025_v27, %v1024_v4 }
 0xd43   :  { %v1027_v37 = vrot.slane %v1026_v6, 2 }
 0xd45   :  { %v1028_v8 = vadd.f32 %v1027_v37, %v1026_v6 }
 0xd47   :  { %v1029_v9 = vrot.slane %v1028_v8, 1 }
 0xd49   :  { %v1030_v20 = vadd.f32 %v1029_v9, %v1028_v8 }
 0xd4b   :  { %1036 = vrot.lane.b32.xlu1 %v1030_v20, %s1719_s2 }
 0xdbd   :  { %v1037_v11 = vpop.permute.xlu1 %1036 }
 0xdbe   :  { %v1041_v12 = vsel %vm1040_vm10, %v1039_v10, %v1037_v11 }
 0xdbf   :  { %v1042_v13 = vpack.c.bf16 %v1041_v12, %v1041_v12 }
 0xdc1   :  { %v1061_v14 = vshrl.u32 %v1042_v13, 16 }
 0xdc3   :  { %v1063_v15 = vrot.slane %v1061_v14, 1 }
 0xdc5   :  { %1540 = vmatmul.mubr.bf16.vlgmr.msra.gmra.mrb[20].mxu1 %v1063_v15 }
 0xe98   :  { %v1147_v22 = vpop.f32.mrb[20].mxu1 }
 0xe99   :  { %v1148_v23 = vadd.f32 %v1147_v22, %v1059_v21  ;;  %v1541_v24 = vpop.f32.mrb[21].mxu1 }
 0xe9a   :  { %v1150_v25 = vpop.f32.mrb[22].mxu1 }
 0xe9b   :  { %1684 = vtanh.f32 %v1148_v23  ;;  %v1542_v26 = vpop.f32.mrb[23].mxu1 }
 0xea5   :  { %v1685_v28 = vpop.eup %1684 }
 0xea6   :  { %v1154_v29 = vpack.c.bf16 %v1685_v28, %v1685_v28 }
 0xea8   :  { %1552 = vmatmul.mubr.msk.bf16.vlgmr.msra.gmra.mrb[24].mxu0 %vm216_vm1, %v1154_v29 }
 0xea9   :  { %1559 = vmatprep.mubr.msk.bf16.mxu0 %vm1721_vm5, %v1720_v7  ;;  %1556 = vmatpush3.bf16.msra.mxu0 %v1620_v30 }
 0xeaa   :  { %1557 = vmatprep.subr.bf16.mxu0 %v1720_v7 }
 0xead   :  { %1558 = vmatpush3.bf16.msra.mxu0 %v1621_v31 }
 0xeae   :  { %1563 = vmatprep.subr.bf16.mxu0 %v1720_v7 }
 0xf7b   :  { %v1225_v33 = vpop.f32.mrb[24].mxu0 }
 0xf7c   :  { %v1226_v34 = vadd.f32 %v1225_v33, %v1163_v32  ;;  %v1553_v36 = vpop.f32.mrb[25].mxu0 }
 0xf7d   :  { %v1228_v38 = vpop.f32.mrb[26].mxu0 }
 0xf7e   :  { %1686 = vtanh.f32 %v1226_v34  ;;  %v1554_v39 = vpop.f32.mrb[27].mxu0 }
 0xf88   :  { %v1687_v40 = vpop.eup %1686 }
 0xf89   :  { %v1232_v41 = vpack.c.bf16 %v1687_v40, %v1687_v40 }
 0xf8b   :  { %1560 = vmatmul.mubr.msk.bf16.vlgmr.msra.gmra.mrb[28].mxu0 %vm120_vm0, %v1232_v41 }
 0xf8c   :  { %1567 = vmatprep.mubr.msk.bf16.mxu0 %vm1721_vm5, %v1720_v7  ;;  %1564 = vmatpush3.bf16.msra.mxu0 %v1622_v42 }
 0xf8d   :  { %1565 = vmatprep.subr.bf16.mxu0 %v1720_v7  ;;  %v1299_v7 = vld [vmem:[%s2193_s23] sm:$0x1] }
 0xf90   :  { %1566 = vmatpush3.bf16.msra.mxu0 %v1623_v43 }
0x105e   :  { %v1287_v45 = vpop.f32.mrb[28].mxu0 }
0x105f   :  { %v1288_v46 = vadd.f32 %v1287_v45, %v1237_v44  ;;  %v1561_v47 = vpop.f32.mrb[29].mxu0 }
0x1060   :  { %v1290_v48 = vpop.f32.mrb[30].mxu0 }
0x1061   :  { %1688 = vtanh.f32 %v1288_v46  ;;  %v1562_v49 = vpop.f32.mrb[31].mxu0 }
0x106b   :  { %v1689_v50 = vpop.eup %1688 }
0x106c   :  { %v1294_v51 = vpack.c.bf16 %v1689_v50, %v1689_v50 }
0x106e   :  { %1568 = vmatmul.mubr.msk.bf16.vlgmr.msra.gmra.mrb[32].mxu0 %vm120_vm0, %v1294_v51 }
0x1141   :  { %v1349_v52 = vpop.f32.mrb[32].mxu0 }
0x1142   :  { %v1350_v53 = vadd.f32 %v1349_v52, %v1299_v7  ;;  %v1569_v54 = vpop.f32.mrb[33].mxu0 }
0x1143   :  { %v1352_v55 = vpop.f32.mrb[34].mxu0 }
0x1144   :  { %v1442_v56 = vmul.f32 -1.442695, %v1350_v53  ;;  %v1570_v57 = vpop.f32.mrb[35].mxu0 }
0x1146   :  { %1690 = vpow2.f32 %v1442_v56 }
0x1150   :  { %v1691_v58 = vpop.eup %1690 }
0x1151   :  { %v1358_v59 = vadd.f32 1.0, %v1691_v58 }
0x1153   :  { %1692 = vrcp.f32 %v1358_v59 }
0x115d   :  { %v1693_v60 = vpop.eup %1692 }
0x115e   :  { %1362 = vst.msk [vmem:[#allocation5] sm:$0x1] %vm1361_vm11, %v1693_v60 }
0x115f   :  { %1705 = shalt.err (!%p1702_p4)
}
0x1160   :  { %s1706_s16 = scalar_lea.hbm %s2194_s24, 16 }
0x1161   :  { %p1707_p5 = scmp.ne.s32.totalorder %s2194_s24, %s1706_s16  ;;  %p1710_p6 = scmp.lt.u32.totalorder %s1706_s16, %s2194_s24 }
0x1163   :  { %p1712_p7 = pnand %p1710_p6, %p1707_p5 }
0x1165   :  { %1715 = shalt.err (!%p1712_p7)
}
0x1166   :  { %1372 = dma.vmem_to_hbm [thread:$0]  %s1370_s22, 16, %s2194_s24, [#allocation6]  }
0x1167   :  { %1716 = dma.done.wait [#allocation6], 16  }
0x1168   :  { %1717 = vsyncadd [#allocation6], 4294967280 }
0x1169   :  { %1376 = vsyncpa [#allocation6], 1 }

</bundles_post_ra>
